<compile_context>
chip_gen: v5e
topology: v5e:2x2
jax: 0.10.0
libtpu: 0.0.40
codegen_flags: <defaults>
</compile_context>

<pallas_src>
import jax
import jax.numpy as jnp
from jax.experimental import pallas as pl
from jax.experimental.pallas import tpu as pltpu


def _round_up(x, m):
    return ((x + m - 1) // m) * m


def ensemble_fused_kernel(xt_ref, w1t_ref, b1t_ref, w2t_ref, b2t_ref, ot_ref):
    # xt_ref  : (Din, TB)   batch tile (features on sublanes, batch on lanes)
    # w1t_ref : (E*H, Din)  all members' first-layer weights (resident)
    # b1t_ref : (E*H, 1)
    # w2t_ref : (E, E*H)    block-diagonal second-layer weights (resident)
    # b2t_ref : (E, 1)
    # ot_ref  : (E, TB)     lane-dense output tile
    h = jnp.dot(w1t_ref[...], xt_ref[...],
                preferred_element_type=jnp.float32)            # (E*H, TB)
    h = jnp.maximum(h + b1t_ref[...], 0.0)                     # bias + ReLU (f32 VPU)
    out = jnp.dot(w2t_ref[...], h,
                  preferred_element_type=jnp.float32)          # (E, TB)
    ot_ref[...] = (out + b2t_ref[...]).astype(ot_ref.dtype)


def ensemble_forward(drug_features, drug_pairs, W1, b1, W2, b2, *, b_tile=8192):
    """EnsembleModel.forward: all members' MLPs fused into one Pallas call.

    drug_features: (N_drugs, F) f32, drug_pairs: (B, 2) int32,
    W1: (E, Din, H), b1: (E, H), W2: (E, H, 1), b2: (E, 1) with Din = 2*F.
    Returns (B, E), matching torch.cat([model_i(...) for model_i in models], dim=1).
    """
    E, Din, H = W1.shape
    assert W2.shape == (E, H, 1)                   # predictor_layers[-1] == 1
    EH = E * H
    B = drug_pairs.shape[0]

    # --- predictor feature construction (glue), built directly feature-major ---
    # x_t[:, b] = concat(feat[pair[b,0]], feat[pair[b,1]])  -> (Din, B)
    feats_t = drug_features.T                                         # (F, N) tiny
    x_t = jnp.concatenate([feats_t[:, drug_pairs[:, 0]],
                           feats_t[:, drug_pairs[:, 1]]], axis=0)     # (Din, B)
    x_t = x_t.astype(jnp.float32)

    # --- one-time layout plumbing (XLA side, outside the kernel) ---------------
    # W1_t[e*H + j, i] = W1[e, i, j]
    W1_t = jnp.transpose(W1, (0, 2, 1)).reshape(EH, Din)
    b1_t = b1.reshape(EH, 1)
    # Block-diagonal second layer: W2_t[e', e*H + j] = W2[e, j, 0] * (e == e')
    w2 = W2[..., 0]                                                   # (E, H)
    W2_t = (jnp.eye(E, dtype=W2.dtype)[:, :, None] * w2[None, :, :]).reshape(E, EH)
    b2_t = b2.reshape(E, 1)

    # --- batch tiling -----------------------------------------------------------
    # Large tiles (default 8192 columns) keep the HBM-bound kernel near roofline;
    # tile is a multiple of 128 so the (E, tb) output block stays lane-dense, and
    # is capped at ceil(B/2) so grid >= 2 (both v7x TensorCores get work).
    if B < 256:
        tb = B                                     # single block == full array dims
    else:
        tb = min(b_tile, _round_up(pl.cdiv(B, 2), 128))
    grid_b = pl.cdiv(B, tb)

    flops = 2 * B * (Din * EH + EH * E)
    bytes_accessed = 4 * (B * Din + Din * EH + EH + EH * E + E + B * E)

    out_t = pl.pallas_call(
        ensemble_fused_kernel,
        out_shape=jax.ShapeDtypeStruct((E, B), jnp.float32),
        grid_spec=pltpu.PrefetchScalarGridSpec(
            num_scalar_prefetch=0,
            grid=(grid_b,),
            in_specs=[
                pl.BlockSpec((Din, tb), lambda i: (0, i)),   # x_t batch tile
                pl.BlockSpec((EH, Din), lambda i: (0, 0)),   # W1_t (resident)
                pl.BlockSpec((EH, 1), lambda i: (0, 0)),     # b1_t
                pl.BlockSpec((E, EH), lambda i: (0, 0)),     # W2_t block-diagonal
                pl.BlockSpec((E, 1), lambda i: (0, 0)),      # b2_t
            ],
            out_specs=pl.BlockSpec((E, tb), lambda i: (0, i)),
        ),
        compiler_params=pltpu.CompilerParams(
            dimension_semantics=("parallel",),               # batch axis -> megacore
            vmem_limit_bytes=32 * 1024 * 1024),              # covers v5e's 16 MiB default
        cost_estimate=pl.CostEstimate(
            flops=flops, transcendentals=0, bytes_accessed=bytes_accessed),
    )(x_t, W1_t, b1_t, W2_t, b2_t)

    # Preserve the torch.cat(dim=1) contract: (E, B) -> (B, E).  Tiny transpose.
    return out_t.T


def ensemble_loss(output, scores):
    """Mirrors EnsembleModel.loss: mean over members of per-member MSE (JAX glue)."""
    gt = scores[:, None]                               # (B, 1)
    per_member = jnp.mean((output - gt) ** 2, axis=0)  # (E,)
    return jnp.mean(per_member)


if __name__ == "__main__":
    key = jax.random.PRNGKey(0)

    # --- small, deterministic synthetic "data" + batch -----------------------
    ENSEMBLE_SIZE = 4          # config['ensemble_size']
    N_DRUGS = 10               # number of drugs in `data`
    FEAT = 16                  # per-drug feature dim
    HIDDEN = 32                # config['predictor_layers'] = [2*FEAT, HIDDEN, 1]
    BATCH = 8                  # drug-drug batch size

    k_feat, k_idx, k_score, k_w1, k_b1, k_w2, k_b2 = jax.random.split(key, 7)

    drug_features = jax.random.normal(k_feat, (N_DRUGS, FEAT), dtype=jnp.float32)
    drug_pairs = jax.random.randint(k_idx, (BATCH, 2), 0, N_DRUGS)
    scores = jax.random.normal(k_score, (BATCH,), dtype=jnp.float32)
    DIN = 2 * FEAT

    # Deterministic ensemble parameters (one MLP [DIN, HIDDEN, 1] per member).
    W1 = jax.random.normal(k_w1, (ENSEMBLE_SIZE, DIN, HIDDEN), dtype=jnp.float32) * 0.1
    b1 = jax.random.normal(k_b1, (ENSEMBLE_SIZE, HIDDEN), dtype=jnp.float32) * 0.01
    W2 = jax.random.normal(k_w2, (ENSEMBLE_SIZE, HIDDEN, 1), dtype=jnp.float32) * 0.1
    b2 = jax.random.normal(k_b2, (ENSEMBLE_SIZE, 1), dtype=jnp.float32) * 0.01

    # --- run fused Pallas kernel ----------------------------------------------
    out = ensemble_forward(drug_features, drug_pairs, W1, b1, W2, b2)
    out = jax.block_until_ready(out)
    assert out.shape == (BATCH, ENSEMBLE_SIZE)

    # --- reference check in plain JAX ------------------------------------------
    x_feats = jnp.concatenate(
        [drug_features[drug_pairs[:, 0]], drug_features[drug_pairs[:, 1]]],
        axis=1)                                          # (BATCH, 2*FEAT)
    ref_cols = []
    for e in range(ENSEMBLE_SIZE):
        h = jnp.maximum(x_feats @ W1[e] + b1[e], 0.0)
        ref_cols.append(h @ W2[e] + b2[e])               # (BATCH, 1)
    ref = jnp.concatenate(ref_cols, axis=1)              # torch.cat(dim=1)
    assert jnp.allclose(out, ref, atol=1e-5, rtol=1e-5)

    # loss (glue, matches EnsembleModel.loss semantics)
    _ = jax.block_until_ready(ensemble_loss(out, scores))

    print("KERNEL_OK")
</pallas_src>

<mosaic_0001>
module attributes {stable_mosaic.version = 11 : i64} {
  func.func @ensemble_fused_kernel(%arg0: i32, %arg1: memref<32x8xf32, #tpu.memory_space<vmem>>, %arg2: memref<128x32xf32, #tpu.memory_space<vmem>>, %arg3: memref<128x1xf32, #tpu.memory_space<vmem>>, %arg4: memref<4x128xf32, #tpu.memory_space<vmem>>, %arg5: memref<4x1xf32, #tpu.memory_space<vmem>>, %arg6: memref<4x8xf32, #tpu.memory_space<vmem>>) attributes {dimension_semantics = [#tpu.dimension_semantics<parallel>], iteration_bounds = array<i64: 1>, scalar_prefetch = 0 : i64, scratch_operands = 0 : i64, tpu.core_type = #tpu.core_type<tc>, window_params = [{transform_indices = @transform_0, window_bounds = array<i64: 32, 8>}, {pipeline_mode = #tpu.pipeline_mode<synchronous>, transform_indices = @transform_1, window_bounds = array<i64: 128, 32>}, {pipeline_mode = #tpu.pipeline_mode<synchronous>, transform_indices = @transform_2, window_bounds = array<i64: 128, 1>}, {pipeline_mode = #tpu.pipeline_mode<synchronous>, transform_indices = @transform_3, window_bounds = array<i64: 4, 128>}, {pipeline_mode = #tpu.pipeline_mode<synchronous>, transform_indices = @transform_4, window_bounds = array<i64: 4, 1>}, {transform_indices = @transform_5, window_bounds = array<i64: 4, 8>}]} {
    %c0 = arith.constant 0 : index
    %c0_0 = arith.constant 0 : index
    %0 = vector.load %arg2[%c0, %c0_0] : memref<128x32xf32, #tpu.memory_space<vmem>>, vector<128x32xf32>
    %c0_1 = arith.constant 0 : index
    %c0_2 = arith.constant 0 : index
    %1 = vector.load %arg1[%c0_1, %c0_2] : memref<32x8xf32, #tpu.memory_space<vmem>>, vector<32x8xf32>
    %cst = arith.constant dense<0.000000e+00> : vector<128x8xf32>
    %2 = tpu.matmul %0, %1, %cst {dimension_numbers = #tpu.dot_dimension_numbers<[1], [0], [0], [1], [0, 0, 1, 1], [], []>} : vector<128x32xf32>, vector<32x8xf32>, vector<128x8xf32> -> vector<128x8xf32>
    %c0_3 = arith.constant 0 : index
    %c0_4 = arith.constant 0 : index
    %3 = vector.load %arg3[%c0_3, %c0_4] : memref<128x1xf32, #tpu.memory_space<vmem>>, vector<128x1xf32>
    %4 = vector.broadcast %3 : vector<128x1xf32> to vector<128x8xf32>
    %5 = arith.addf %2, %4 : vector<128x8xf32>
    %cst_5 = arith.constant 0.000000e+00 : f32
    %6 = vector.broadcast %cst_5 : f32 to vector<128x8xf32>
    %7 = arith.maximumf %5, %6 : vector<128x8xf32>
    %c0_6 = arith.constant 0 : index
    %c0_7 = arith.constant 0 : index
    %8 = vector.load %arg4[%c0_6, %c0_7] : memref<4x128xf32, #tpu.memory_space<vmem>>, vector<4x128xf32>
    %cst_8 = arith.constant dense<0.000000e+00> : vector<4x8xf32>
    %9 = tpu.matmul %8, %7, %cst_8 {dimension_numbers = #tpu.dot_dimension_numbers<[1], [0], [0], [1], [0, 0, 1, 1], [], []>} : vector<4x128xf32>, vector<128x8xf32>, vector<4x8xf32> -> vector<4x8xf32>
    %c0_9 = arith.constant 0 : index
    %c0_10 = arith.constant 0 : index
    %10 = vector.load %arg5[%c0_9, %c0_10] : memref<4x1xf32, #tpu.memory_space<vmem>>, vector<4x1xf32>
    %11 = vector.broadcast %10 : vector<4x1xf32> to vector<4x8xf32>
    %12 = arith.addf %9, %11 : vector<4x8xf32>
    %c0_11 = arith.constant 0 : index
    %c0_12 = arith.constant 0 : index
    %13 = vector.load %arg6[%c0_11, %c0_12] : memref<4x8xf32, #tpu.memory_space<vmem>>, vector<4x8xf32>
    tpu.vector_store %arg6[%c0_11, %c0_12], %12 {strides = array<i32>} : memref<4x8xf32, #tpu.memory_space<vmem>>, vector<4x8xf32>,
    return
  }
  func.func @transform_0(%arg0: i32) -> (i32, i32) {
    %c0_i32 = arith.constant 0 : i32
    %c0_i32_0 = arith.constant 0 : i32
    return %c0_i32, %arg0 : i32, i32
  }
  func.func @transform_1(%arg0: i32) -> (i32, i32) {
    %c0_i32 = arith.constant 0 : i32
    %c0_i32_0 = arith.constant 0 : i32
    %c0_i32_1 = arith.constant 0 : i32
    return %c0_i32, %c0_i32_0 : i32, i32
  }
  func.func @transform_2(%arg0: i32) -> (i32, i32) {
    %c0_i32 = arith.constant 0 : i32
    %c0_i32_0 = arith.constant 0 : i32
    %c0_i32_1 = arith.constant 0 : i32
    return %c0_i32, %c0_i32_0 : i32, i32
  }
  func.func @transform_3(%arg0: i32) -> (i32, i32) {
    %c0_i32 = arith.constant 0 : i32
    %c0_i32_0 = arith.constant 0 : i32
    %c0_i32_1 = arith.constant 0 : i32
    return %c0_i32, %c0_i32_0 : i32, i32
  }
  func.func @transform_4(%arg0: i32) -> (i32, i32) {
    %c0_i32 = arith.constant 0 : i32
    %c0_i32_0 = arith.constant 0 : i32
    %c0_i32_1 = arith.constant 0 : i32
    return %c0_i32, %c0_i32_0 : i32, i32
  }
  func.func @transform_5(%arg0: i32) -> (i32, i32) {
    %c0_i32 = arith.constant 0 : i32
    %c0_i32_0 = arith.constant 0 : i32
    return %c0_i32, %arg0 : i32, i32
  }
}

</mosaic_0001>

<bundles_post_ra>
// kernel: tpu_custom_call.1
= control target key start
LH: loop header
LB: loop body
LE: loop exit
PB: predicated region body
PF: predicated region fallthrough
CT: control target
= control target key end

     0   :  { %v367_v3 = vmov 0   ;;  %vm137_vm0 = vcmask 261120   ;;  %s535_s0 = inlined_call_operand.vmem [shape: f32[32,8], index: 0, kind: input, shape index: {}]   ;;  %s536_s1 = inlined_call_operand.vmem [shape: f32[128,32], index: 1, kind: input, shape index: {}]   ;;  %s537_s2 = inlined_call_operand.vmem [shape: f32[128,1], index: 2, kind: input, shape index: {}]   ;;  %s538_s3 = inlined_call_operand.vmem [shape: f32[4,128], index: 3, kind: input, shape index: {}]   ;;  %s539_s4 = inlined_call_operand.vmem [shape: f32[4,1], index: 4, kind: input, shape index: {}]   ;;  %s540_s5 = inlined_call_operand.hbm [shape: f32[4,8], index: 5, kind: output, shape index: {}]  }
   0x1   :  { %v40_v0 = vld [vmem:[%s535_s0 + $0x18] sm:$0xff]  ;;  %v39_v1 = vld [vmem:[%s535_s0 + $0x10] sm:$0xff]  ;;  %v38_v2 = vld [vmem:[%s535_s0 + $0x8] sm:$0xff]  ;;  %338 = vset.pattern.permute.xlu0 %v367_v3  ;;  %339 = vset.pattern.permute.xlu1 %v367_v3 }
   0x2   :  { %328 = vmatpush.msra.mxu2 %v40_v0  ;;  %329 = vmatpush.msra.mxu3 %v40_v0  ;;  %v56_v4 = vld [vmem:[%s537_s2 + $0x78] sm:$0xff]  ;;  %v37_v5 = vld [vmem:[%s535_s0] sm:$0xff]  ;;  %v26_v6 = vld [vmem:[%s536_s1 + $0x28] sm:$0xff] }
   0x3   :  { %198 = vmatpush.msra.mxu0 %v40_v0  ;;  %134 = vperm.xlu0 %338, %v56_v4   ;;  %v31_v7 = vld [vmem:[%s536_s1 + $0x50] sm:$0xff]  ;;  %v54_v8 = vld [vmem:[%s537_s2 + $0x68] sm:$0xff]  ;;  %v21_v9 = vld [vmem:[%s536_s1] sm:$0xff] }
   0x4   :  { %330 = vmatpush.msra.mxu2 %v39_v1  ;;  %331 = vmatpush.msra.mxu3 %v39_v1  ;;  %v52_v10 = vld [vmem:[%s537_s2 + $0x58] sm:$0xff]  ;;  %v55_v11 = vld [vmem:[%s537_s2 + $0x70] sm:$0xff] }
   0x5   :  { %199 = vmatpush.msra.mxu0 %v39_v1  ;;  %124 = vperm.xlu1 %339, %v54_v8  }
   0x6   :  { %332 = vmatpush.msra.mxu2 %v38_v2  ;;  %333 = vmatpush.msra.mxu3 %v38_v2 }
   0x7   :  { %200 = vmatpush.msra.mxu0 %v38_v2 }
   0x8   :  { %334 = vmatpush.msra.mxu2 %v37_v5  ;;  %335 = vmatpush.msra.mxu3 %v37_v5 }
   0x9   :  { %317 = vmatmul.msk.f32.vlgmr.msra.gmra.mxu2 %vm137_vm0, %v26_v6  ;;  %322 = vmatmul.msk.f32.vlgmr.msra.gmra.mxu3 %vm137_vm0, %v31_v7 }
   0xa   :  { %201 = vmatpush.msra.mxu0 %v37_v5 }
   0xb   :  { %10 = vsyncpa [#allocation3], 0  ;;  %312 = vmatmul.msk.f32.vlgmr.msra.gmra.mxu0 %vm137_vm0, %v21_v9  ;;  %340 = vset.pattern.permute.xlu2 %v367_v3  ;;  %v27_v12 = vld [vmem:[%s536_s1 + $0x30] sm:$0xff]  ;;  %v32_v13 = vld [vmem:[%s536_s1 + $0x58] sm:$0xff]  ;;  %s303_s17 = sshll.u32 %s540_s5, 4  ;;  %vm294_vm1 = vcmask 60416   ;;  %s304_s17 = int_to_ptr.hbm [resolvable:$true] %s303_s17 }
   0xc   :  { %114 = vperm.xlu2 %340, %v52_v10   ;;  %129 = vperm.xlu0 %338, %v55_v11   ;;  %v53_v14 = vld [vmem:[%s537_s2 + $0x60] sm:$0xff]  ;;  %v22_v15 = vld [vmem:[%s536_s1 + $0x8] sm:$0xff]  ;;  %v51_v16 = vld [vmem:[%s537_s2 + $0x50] sm:$0xff] }
   0xd   :  { %119 = vperm.xlu1 %339, %v53_v14   ;;  %v50_v17 = vld [vmem:[%s537_s2 + $0x48] sm:$0xff]  ;;  %v28_v18 = vld [vmem:[%s536_s1 + $0x38] sm:$0xff]  ;;  %v33_v19 = vld [vmem:[%s536_s1 + $0x60] sm:$0xff] }
   0xe   :  { %v49_v20 = vld [vmem:[%s537_s2 + $0x40] sm:$0xff]  ;;  %v23_v21 = vld [vmem:[%s536_s1 + $0x10] sm:$0xff]  ;;  %v48_v22 = vld [vmem:[%s537_s2 + $0x38] sm:$0xff] }
   0xf   :  { %v47_v23 = vld [vmem:[%s537_s2 + $0x30] sm:$0xff]  ;;  %v29_v24 = vld [vmem:[%s536_s1 + $0x40] sm:$0xff]  ;;  %v34_v25 = vld [vmem:[%s536_s1 + $0x68] sm:$0xff] }
  0x10   :  { %v46_v26 = vld [vmem:[%s537_s2 + $0x28] sm:$0xff]  ;;  %v24_v27 = vld [vmem:[%s536_s1 + $0x18] sm:$0xff]  ;;  %v45_v28 = vld [vmem:[%s537_s2 + $0x20] sm:$0xff] }
  0x11   :  { %318 = vmatmul.msk.f32.gmra.mxu2 %vm137_vm0, %v27_v12  ;;  %323 = vmatmul.msk.f32.gmra.mxu3 %vm137_vm0, %v32_v13  ;;  %v44_v29 = vld [vmem:[%s537_s2 + $0x18] sm:$0xff]  ;;  %v30_v30 = vld [vmem:[%s536_s1 + $0x48] sm:$0xff]  ;;  %v35_v31 = vld [vmem:[%s536_s1 + $0x70] sm:$0xff] }
  0x12   :  { %v43_v32 = vld [vmem:[%s537_s2 + $0x10] sm:$0xff]  ;;  %v25_v33 = vld [vmem:[%s536_s1 + $0x20] sm:$0xff]  ;;  %v42_v34 = vld [vmem:[%s537_s2 + $0x8] sm:$0xff] }
  0x13   :  { %313 = vmatmul.msk.f32.gmra.mxu0 %vm137_vm0, %v22_v15  ;;  %v41_v35 = vld [vmem:[%s537_s2] sm:$0xff]  ;;  %v36_v36 = vld [vmem:[%s536_s1 + $0x78] sm:$0xff] }
  0x14   :  { %109 = vperm.xlu2 %340, %v51_v16   ;;  %104 = vperm.xlu0 %338, %v50_v17   ;;  %v268_v37 = vld [vmem:[%s539_s4] sm:$0xf]  ;;  %s368_s4 = smov [#allocation2]  }
  0x15   :  { %99 = vperm.xlu1 %339, %v49_v20   ;;  %s301_s14 = sshll.u32 %s368_s4, 4  ;;  %s302_s14 = int_to_ptr.vmem [resolvable:$true] %s301_s14 }
  0x19   :  { %319 = vmatmul.msk.f32.gmra.mxu2 %vm137_vm0, %v28_v18  ;;  %324 = vmatmul.msk.f32.gmra.mxu3 %vm137_vm0, %v33_v19 }
  0x1b   :  { %314 = vmatmul.msk.f32.gmra.mxu0 %vm137_vm0, %v23_v21 }
  0x1c   :  { %94 = vperm.xlu2 %340, %v48_v22   ;;  %89 = vperm.xlu0 %338, %v47_v23  }
  0x1d   :  { %84 = vperm.xlu1 %339, %v46_v26  }
  0x21   :  { %320 = vmatmul.msk.f32.gmra.mxu2 %vm137_vm0, %v29_v24  ;;  %325 = vmatmul.msk.f32.gmra.mxu3 %vm137_vm0, %v34_v25 }
  0x23   :  { %315 = vmatmul.msk.f32.gmra.mxu0 %vm137_vm0, %v24_v27 }
  0x24   :  { %79 = vperm.xlu2 %340, %v45_v28   ;;  %74 = vperm.xlu0 %338, %v44_v29  }
  0x25   :  { %69 = vperm.xlu1 %339, %v43_v32  }
  0x29   :  { %321 = vmatmul.msk.f32.gmra.mxu2 %vm137_vm0, %v30_v30  ;;  %326 = vmatmul.msk.f32.gmra.mxu3 %vm137_vm0, %v35_v31 }
  0x2b   :  { %316 = vmatmul.msk.f32.gmra.mxu0 %vm137_vm0, %v25_v33 }
  0x2c   :  { %64 = vperm.xlu2 %340, %v42_v34   ;;  %59 = vperm.xlu0 %338, %v41_v35  }
  0x2d   :  { %271 = vperm.xlu1 %339, %v268_v37  }
  0x31   :  { %327 = vmatmul.msk.f32.gmra.mxu3 %vm137_vm0, %v36_v36 }
  0x66   :  { %v115_v47 = vpop.permute.xlu2 %114 }
  0x6e   :  { %v110_v53 = vpop.permute.xlu2 %109 }
  0x75   :  { %v135_v41 = vpop.permute.xlu0 %134 }
  0x76   :  { %v95_v63 = vpop.permute.xlu2 %94 }
  0x77   :  { %v125_v45 = vpop.permute.xlu1 %124 }
  0x7e   :  { %v130_v48 = vpop.permute.xlu0 %129  ;;  %v80_v14 = vpop.permute.xlu2 %79 }
  0x7f   :  { %v120_v52 = vpop.permute.xlu1 %119 }
  0x86   :  { %v105_v54 = vpop.permute.xlu0 %104  ;;  %v65_v28 = vpop.permute.xlu2 %64 }
  0x87   :  { %v100_v62 = vpop.permute.xlu1 %99 }
  0x88   :  { %v526_v43 = vpop.f32.mrf.mxu0 }
  0x8c   :  { %v233_v38 = vpop.f32.mrf.mxu3  ;;  %v218_v39 = vpop.f32.mrf.mxu2 }
  0x8d   :  { %v234_v7 = vadd.f32 %v233_v38, %v110_v53  ;;  %v267_v38 = vld [vmem:[%s538_s3] sm:$0xf] }
  0x8e   :  { %v90_v2 = vpop.permute.xlu0 %89 }
  0x8f   :  { %v261_v11 = vmax.f32 %v234_v7, 0.0  ;;  %v85_v13 = vpop.permute.xlu1 %84 }
  0x90   :  { %v206_v49 = vpop.f32.mrf.mxu0  ;;  %v219_v21 = vadd.f32 %v218_v39, %v85_v13 }
  0x91   :  { %v207_v33 = vadd.f32 %v206_v49, %v65_v28 }
  0x92   :  { %v256_v25 = vmax.f32 %v219_v21, 0.0 }
  0x93   :  { %v252_v36 = vmax.f32 %v207_v33, 0.0 }
  0x94   :  { %v236_v40 = vpop.f32.mrf.mxu3  ;;  %v221_v44 = vpop.f32.mrf.mxu2 }
  0x95   :  { %v237_v3 = vadd.f32 %v236_v40, %v115_v47  ;;  %v222_v18 = vadd.f32 %v221_v44, %v90_v2 }
  0x96   :  { %v75_v17 = vpop.permute.xlu0 %74 }
  0x97   :  { %v262_v9 = vmax.f32 %v237_v3, 0.0  ;;  %v257_v23 = vmax.f32 %v222_v18, 0.0  ;;  %v70_v27 = vpop.permute.xlu1 %69 }
  0x98   :  { %v209_v55 = vpop.f32.mrf.mxu0 }
  0x99   :  { %v210_v29 = vadd.f32 %v209_v55, %v70_v27 }
  0x9b   :  { %v253_v34 = vmax.f32 %v210_v29, 0.0 }
  0x9c   :  { %v239_v42 = vpop.f32.mrf.mxu3  ;;  %v224_v50 = vpop.f32.mrf.mxu2 }
  0x9d   :  { %v240_v0 = vadd.f32 %v239_v42, %v120_v52  ;;  %v225_v15 = vadd.f32 %v224_v50, %v95_v63 }
  0x9e   :  { %v60_v31 = vpop.permute.xlu0 %59 }
  0x9f   :  { %v263_v8 = vmax.f32 %v240_v0, 0.0  ;;  %v258_v22 = vmax.f32 %v225_v15, 0.0  ;;  %v204_v35 = vadd.f32 %v526_v43, %v60_v31  ;;  %v272_v39 = vpop.permute.xlu1 %271 }
  0xa0   :  { %v212_v5 = vpop.f32.mrf.mxu0 }
  0xa1   :  { %v213_v26 = vadd.f32 %v212_v5, %v75_v17  ;;  %v251_v37 = vmax.f32 %v204_v35, 0.0 }
  0xa3   :  { %v254_v32 = vmax.f32 %v213_v26, 0.0 }
  0xa4   :  { %v242_v46 = vpop.f32.mrf.mxu3  ;;  %v227_v56 = vpop.f32.mrf.mxu2 }
  0xa5   :  { %v243_v60 = vadd.f32 %v242_v46, %v125_v45  ;;  %v228_v12 = vadd.f32 %v227_v56, %v100_v62 }
  0xa7   :  { %v264_v4 = vmax.f32 %v243_v60, 0.0  ;;  %v259_v19 = vmax.f32 %v228_v12, 0.0 }
  0xa8   :  { %v215_v20 = vpop.f32.mrf.mxu0 }
  0xa9   :  { %v216_v24 = vadd.f32 %v215_v20, %v80_v14 }
  0xab   :  { %v255_v30 = vmax.f32 %v216_v24, 0.0 }
  0xac   :  { %v245_v51 = vpop.f32.mrf.mxu3  ;;  %v230_v6 = vpop.f32.mrf.mxu2 }
  0xad   :  { %v246_v58 = vadd.f32 %v245_v51, %v130_v48  ;;  %v231_v10 = vadd.f32 %v230_v6, %v105_v54 }
  0xaf   :  { %v265_v1 = vmax.f32 %v246_v58, 0.0  ;;  %v260_v16 = vmax.f32 %v231_v10, 0.0 }
  0xb4   :  { %v248_v57 = vpop.f32.mrf.mxu3 }
  0xb5   :  { %v249_v59 = vadd.f32 %v248_v57, %v135_v41 }
  0xb7   :  { %v266_v61 = vmax.f32 %v249_v59, 0.0 }
  0xb9   :  { %274 = vmatpush.msra.mxu1 %v266_v61 }
  0xbb   :  { %275 = vmatpush.msra.mxu1 %v265_v1 }
  0xbd   :  { %276 = vmatpush.msra.mxu1 %v264_v4 }
  0xbf   :  { %277 = vmatpush.msra.mxu1 %v263_v8 }
  0xc1   :  { %278 = vmatpush.msra.mxu1 %v262_v9 }
  0xc3   :  { %279 = vmatpush.msra.mxu1 %v261_v11 }
  0xc5   :  { %280 = vmatpush.msra.mxu1 %v260_v16 }
  0xc7   :  { %281 = vmatpush.msra.mxu1 %v259_v19 }
  0xc9   :  { %282 = vmatpush.msra.mxu1 %v258_v22 }
  0xcb   :  { %283 = vmatpush.msra.mxu1 %v257_v23 }
  0xcd   :  { %284 = vmatpush.msra.mxu1 %v256_v25 }
  0xcf   :  { %285 = vmatpush.msra.mxu1 %v255_v30 }
  0xd1   :  { %286 = vmatpush.msra.mxu1 %v254_v32 }
  0xd3   :  { %287 = vmatpush.msra.mxu1 %v253_v34 }
  0xd5   :  { %288 = vmatpush.msra.mxu1 %v252_v36 }
  0xd7   :  { %289 = vmatpush.msra.mxu1 %v251_v37 }
  0xd8   :  { %290 = vmatmul.f32.vlgmr.msra.gmra.mxu1 %v267_v38 }
 0x155   :  { %v291_v40 = vpop.f32.mrf.mxu1 }
 0x156   :  { %v292_v41 = vadd.f32 %v291_v40, %v272_v39 }
 0x158   :  { %295 = vst.msk [vmem:[#allocation2] sm:$0xf] %vm294_vm1, %v292_v41 }
 0x159   :  { %306 = dma.vmem_to_hbm [thread:$0]  %s302_s14, 64, %s304_s17, [#allocation3]  }
 0x15a   :  { %365 = dma.done.wait [#allocation3], 64  }
 0x15b   :  { %366 = vsyncadd [#allocation3], 4294967232 }
 0x15c   :  { %311 = vsyncpa [#allocation3], 1 }

</bundles_post_ra>
